<compile_context>
chip_gen: v7x
topology: tpu7x:2x2x1
jax: 0.10.0
libtpu: 0.0.40
codegen_flags: <defaults>
</compile_context>

<pallas_src>
import math
import functools

import jax
import jax.numpy as jnp
from jax import lax
from jax.experimental import pallas as pl
from jax.experimental.pallas import tpu as pltpu

# ---- synthetic hyperparameters (deterministic, no data files) ---------------
VOCAB_SIZE = 27        # stands in for len(set(train_text)) — file read replaced
CONTEXT_LENGTH = 3
EMBEDDING_SIZE = 24
HIDDEN_SIZE = 512      # matches the module spec
BATCH = 8
VOCAB_PAD = 128        # lane-dense logits (multiple of 128)


def _mlp_kernel(idx_ref, tgt_ref, wte_ref, w1_ref, b1_ref, w2_ref, b2_ref,
                logits_ref, loss_ref, *, T, V, Vp):
    """Fused: embedding lookup -> Linear -> Tanh -> GELU(exact) -> Linear -> CE loss.

    idx_ref: (T, B, 1) int32   tgt_ref: (B, 1) int32
    wte_ref: (Vp, E) f32 (zero padded rows >= V)
    w1_ref:  (T, E, H) f32     b1_ref: (1, H) f32
    w2_ref:  (H, Vp) f32 (zero padded cols >= V)   b2_ref: (1, Vp) f32
    logits_ref: (B, Vp) f32 out (lane dense)       loss_ref: (1, 1) f32 out
    """
    B = tgt_ref.shape[0]
    H = w1_ref.shape[-1]
    col_iota = lax.broadcasted_iota(jnp.int32, (B, Vp), 1)

    # --- Embedding lookup fused as one-hot matmuls (exact: picks single rows) ---
    # h = sum_t onehot(idx[t]) @ wte_pad @ W1[t]  ==  concat_t(emb_t) @ W1
    h = jnp.zeros((B, H), dtype=jnp.float32)
    for t in range(T):                                   # static, T = 3
        one_hot_t = (idx_ref[t] == col_iota).astype(jnp.float32)          # (B, Vp)
        emb_t = jnp.dot(one_hot_t, wte_ref[...],
                        preferred_element_type=jnp.float32)               # (B, E)
        h = h + jnp.dot(emb_t, w1_ref[t],
                        preferred_element_type=jnp.float32)               # (B, H)

    h = jnp.tanh(h + b1_ref[...])
    # Exact (erf) GELU, matching torch.nn.GELU() default.
    inv_sqrt2 = jnp.float32(1.0 / math.sqrt(2.0))
    g = 0.5 * h * (1.0 + lax.erf(h * inv_sqrt2))                          # (B, H)

    logits = jnp.dot(g, w2_ref[...], preferred_element_type=jnp.float32)
    logits = logits + b2_ref[...]                                         # (B, Vp)
    logits_ref[...] = logits                       # lane-dense, unmasked store

    # --- fused cross-entropy (mean over batch); padded columns masked off ---
    neg_big = jnp.float32(-1e30)
    masked = jnp.where(col_iota < V, logits, neg_big)
    m = jnp.max(masked, axis=-1, keepdims=True)
    z = masked - m
    lse = jnp.log(jnp.sum(jnp.exp(z), axis=-1, keepdims=True))
    logp = z - lse                                                        # (B, Vp)
    tgt_one_hot = (tgt_ref[...] == col_iota).astype(jnp.float32)          # (B, Vp)
    nll = -jnp.sum(tgt_one_hot * logp, axis=-1, keepdims=True)            # (B, 1)
    loss_ref[...] = jnp.sum(nll, axis=0, keepdims=True) * jnp.float32(1.0 / B)


@jax.jit
def mlp_forward(idx, wte, w1, b1, w2, b2, targets=None):
    """Forward pass of the MLP module.

    idx: (B, T) int32; wte: (V, E); w1: (T*E, H); b1: (1, H); w2: (H, V); b2: (1, V)
    targets: optional (B,) int32
    Returns (logits (B, V) f32, loss or None).
    """
    B, T = idx.shape
    V, E = wte.shape
    H = w1.shape[-1]
    Vp = VOCAB_PAD

    # Zero-pad the vocab dimension to 128 lanes; padded logit columns are masked
    # to -1e30 inside the kernel before the softmax, and sliced off here.
    wte_pad = jnp.zeros((Vp, E), jnp.float32).at[:V, :].set(wte.astype(jnp.float32))
    w2_pad = jnp.zeros((H, Vp), jnp.float32).at[:, :V].set(w2.astype(jnp.float32))
    b2_pad = jnp.zeros((1, Vp), jnp.float32).at[:, :V].set(b2.astype(jnp.float32))
    w1_3d = w1.astype(jnp.float32).reshape(T, E, H)

    idx_t = jnp.transpose(idx.astype(jnp.int32)).reshape(T, B, 1)
    tgt = targets if targets is not None else jnp.zeros((B,), jnp.int32)
    tgt2d = tgt.astype(jnp.int32).reshape(B, 1)

    kernel = functools.partial(_mlp_kernel, T=T, V=V, Vp=Vp)
    logits_pad, loss_arr = pl.pallas_call(
        kernel,
        out_shape=(jax.ShapeDtypeStruct((B, Vp), jnp.float32),
                   jax.ShapeDtypeStruct((1, 1), jnp.float32)),
        # Tiny problem: single ungridded block, everything resident in VMEM.
        in_specs=[pl.BlockSpec(memory_space=pltpu.MemorySpace.VMEM)] * 7,
        out_specs=(pl.BlockSpec(memory_space=pltpu.MemorySpace.VMEM),
                   pl.BlockSpec(memory_space=pltpu.MemorySpace.VMEM)),
    )(idx_t, tgt2d, wte_pad, w1_3d, b1.astype(jnp.float32), w2_pad, b2_pad)

    logits = logits_pad[:, :V]
    loss = loss_arr[0, 0] if targets is not None else None
    return logits, loss


def _reference_forward(idx, wte, w1, b1, w2, b2, targets):
    """Pure-JAX reference for correctness checking."""
    B, T = idx.shape
    x = jnp.take(wte, idx, axis=0).reshape(B, -1).astype(jnp.float32)
    h = jnp.tanh(x @ w1 + b1)
    g = 0.5 * h * (1.0 + lax.erf(h / jnp.sqrt(jnp.float32(2.0))))
    logits = g @ w2 + b2
    logp = jax.nn.log_softmax(logits, axis=-1)
    loss = -jnp.mean(logp[jnp.arange(B), targets])
    return logits, loss


if __name__ == "__main__":
    key = jax.random.PRNGKey(0)
    k_idx, k_wte, k_w1, k_b1, k_w2, k_b2, k_tgt = jax.random.split(key, 7)

    V, T, E, H, B = VOCAB_SIZE, CONTEXT_LENGTH, EMBEDDING_SIZE, HIDDEN_SIZE, BATCH
    cin = T * E

    # Deterministic synthetic parameters (shapes from module __init__).
    wte = jax.random.normal(k_wte, (V, E), dtype=jnp.float32)
    w1 = jax.random.uniform(k_w1, (cin, H), dtype=jnp.float32,
                            minval=-1.0 / math.sqrt(cin), maxval=1.0 / math.sqrt(cin))
    b1 = jax.random.uniform(k_b1, (1, H), dtype=jnp.float32,
                            minval=-1.0 / math.sqrt(cin), maxval=1.0 / math.sqrt(cin))
    w2 = jax.random.uniform(k_w2, (H, V), dtype=jnp.float32,
                            minval=-1.0 / math.sqrt(H), maxval=1.0 / math.sqrt(H))
    b2 = jax.random.uniform(k_b2, (1, V), dtype=jnp.float32,
                            minval=-1.0 / math.sqrt(H), maxval=1.0 / math.sqrt(H))

    idx = jax.random.randint(k_idx, (B, T), 0, V, dtype=jnp.int32)
    targets = jax.random.randint(k_tgt, (B,), 0, V, dtype=jnp.int32)

    logits, loss = mlp_forward(idx, wte, w1, b1, w2, b2, targets=targets)
    jax.block_until_ready(logits)
    jax.block_until_ready(loss)

    ref_logits, ref_loss = _reference_forward(idx, wte, w1, b1, w2, b2, targets)
    assert logits.shape == (B, V), f"bad logits shape {logits.shape}"
    assert jnp.allclose(logits, ref_logits, atol=1e-4, rtol=1e-4), "logits mismatch vs reference"
    assert jnp.isfinite(loss), "loss not finite"
    assert jnp.allclose(loss, ref_loss, atol=1e-4, rtol=1e-4), "loss mismatch vs reference"

    print("KERNEL_OK")
</pallas_src>

<mosaic_0001>
module attributes {stable_mosaic.version = 11 : i64} {
  func.func @_mlp_kernel(%arg0: memref<3x8x1xi32, #tpu.memory_space<vmem>>, %arg1: memref<8x1xi32, #tpu.memory_space<vmem>>, %arg2: memref<128x24xf32, #tpu.memory_space<vmem>>, %arg3: memref<3x24x512xf32, #tpu.memory_space<vmem>>, %arg4: memref<1x512xf32, #tpu.memory_space<vmem>>, %arg5: memref<512x128xf32, #tpu.memory_space<vmem>>, %arg6: memref<1x128xf32, #tpu.memory_space<vmem>>, %arg7: memref<8x128xf32, #tpu.memory_space<vmem>>, %arg8: memref<1x1xf32, #tpu.memory_space<vmem>>) attributes {dimension_semantics = [], scalar_prefetch = 0 : i64, scratch_operands = 0 : i64, tpu.core_type = #tpu.core_type<tc>} {
    %0 = tpu.iota {dimensions = array<i32: 1>} : vector<8x128xi32>
    %cst = arith.constant 0.000000e+00 : f32
    %1 = vector.broadcast %cst : f32 to vector<8x512xf32>
    %c0 = arith.constant 0 : index
    %c0_0 = arith.constant 0 : index
    %c0_1 = arith.constant 0 : index
    %2 = vector.load %arg0[%c0, %c0_0, %c0_1] : memref<3x8x1xi32, #tpu.memory_space<vmem>>, vector<1x8x1xi32>
    %3 = vector.shape_cast %2 : vector<1x8x1xi32> to vector<8x1xi32>
    %4 = vector.broadcast %3 : vector<8x1xi32> to vector<8x128xi32>
    %5 = arith.cmpi eq, %4, %0 : vector<8x128xi32>
    %6 = arith.extui %5 : vector<8x128xi1> to vector<8x128xi32>
    %7 = arith.sitofp %6 : vector<8x128xi32> to vector<8x128xf32>
    %c0_2 = arith.constant 0 : index
    %c0_3 = arith.constant 0 : index
    %8 = vector.load %arg2[%c0_2, %c0_3] : memref<128x24xf32, #tpu.memory_space<vmem>>, vector<128x24xf32>
    %cst_4 = arith.constant dense<0.000000e+00> : vector<8x24xf32>
    %9 = tpu.matmul %7, %8, %cst_4 {dimension_numbers = #tpu.dot_dimension_numbers<[1], [0], [0], [1], [0, 0, 1, 1], [], []>} : vector<8x128xf32>, vector<128x24xf32>, vector<8x24xf32> -> vector<8x24xf32>
    %c0_5 = arith.constant 0 : index
    %c0_6 = arith.constant 0 : index
    %c0_7 = arith.constant 0 : index
    %10 = vector.load %arg3[%c0_5, %c0_6, %c0_7] : memref<3x24x512xf32, #tpu.memory_space<vmem>>, vector<1x24x512xf32>
    %11 = vector.shape_cast %10 : vector<1x24x512xf32> to vector<24x512xf32>
    %cst_8 = arith.constant dense<0.000000e+00> : vector<8x512xf32>
    %12 = tpu.matmul %9, %11, %cst_8 {dimension_numbers = #tpu.dot_dimension_numbers<[1], [0], [0], [1], [0, 0, 1, 1], [], []>} : vector<8x24xf32>, vector<24x512xf32>, vector<8x512xf32> -> vector<8x512xf32>
    %13 = arith.addf %1, %12 : vector<8x512xf32>
    %c1 = arith.constant 1 : index
    %c0_9 = arith.constant 0 : index
    %c0_10 = arith.constant 0 : index
    %14 = vector.load %arg0[%c1, %c0_9, %c0_10] : memref<3x8x1xi32, #tpu.memory_space<vmem>>, vector<1x8x1xi32>
    %15 = vector.shape_cast %14 : vector<1x8x1xi32> to vector<8x1xi32>
    %16 = vector.broadcast %15 : vector<8x1xi32> to vector<8x128xi32>
    %17 = arith.cmpi eq, %16, %0 : vector<8x128xi32>
    %18 = arith.extui %17 : vector<8x128xi1> to vector<8x128xi32>
    %19 = arith.sitofp %18 : vector<8x128xi32> to vector<8x128xf32>
    %c0_11 = arith.constant 0 : index
    %c0_12 = arith.constant 0 : index
    %20 = vector.load %arg2[%c0_11, %c0_12] : memref<128x24xf32, #tpu.memory_space<vmem>>, vector<128x24xf32>
    %cst_13 = arith.constant dense<0.000000e+00> : vector<8x24xf32>
    %21 = tpu.matmul %19, %20, %cst_13 {dimension_numbers = #tpu.dot_dimension_numbers<[1], [0], [0], [1], [0, 0, 1, 1], [], []>} : vector<8x128xf32>, vector<128x24xf32>, vector<8x24xf32> -> vector<8x24xf32>
    %c1_14 = arith.constant 1 : index
    %c0_15 = arith.constant 0 : index
    %c0_16 = arith.constant 0 : index
    %22 = vector.load %arg3[%c1_14, %c0_15, %c0_16] : memref<3x24x512xf32, #tpu.memory_space<vmem>>, vector<1x24x512xf32>
    %23 = vector.shape_cast %22 : vector<1x24x512xf32> to vector<24x512xf32>
    %cst_17 = arith.constant dense<0.000000e+00> : vector<8x512xf32>
    %24 = tpu.matmul %21, %23, %cst_17 {dimension_numbers = #tpu.dot_dimension_numbers<[1], [0], [0], [1], [0, 0, 1, 1], [], []>} : vector<8x24xf32>, vector<24x512xf32>, vector<8x512xf32> -> vector<8x512xf32>
    %25 = arith.addf %13, %24 : vector<8x512xf32>
    %c2 = arith.constant 2 : index
    %c0_18 = arith.constant 0 : index
    %c0_19 = arith.constant 0 : index
    %26 = vector.load %arg0[%c2, %c0_18, %c0_19] : memref<3x8x1xi32, #tpu.memory_space<vmem>>, vector<1x8x1xi32>
    %27 = vector.shape_cast %26 : vector<1x8x1xi32> to vector<8x1xi32>
    %28 = vector.broadcast %27 : vector<8x1xi32> to vector<8x128xi32>
    %29 = arith.cmpi eq, %28, %0 : vector<8x128xi32>
    %30 = arith.extui %29 : vector<8x128xi1> to vector<8x128xi32>
    %31 = arith.sitofp %30 : vector<8x128xi32> to vector<8x128xf32>
    %c0_20 = arith.constant 0 : index
    %c0_21 = arith.constant 0 : index
    %32 = vector.load %arg2[%c0_20, %c0_21] : memref<128x24xf32, #tpu.memory_space<vmem>>, vector<128x24xf32>
    %cst_22 = arith.constant dense<0.000000e+00> : vector<8x24xf32>
    %33 = tpu.matmul %31, %32, %cst_22 {dimension_numbers = #tpu.dot_dimension_numbers<[1], [0], [0], [1], [0, 0, 1, 1], [], []>} : vector<8x128xf32>, vector<128x24xf32>, vector<8x24xf32> -> vector<8x24xf32>
    %c2_23 = arith.constant 2 : index
    %c0_24 = arith.constant 0 : index
    %c0_25 = arith.constant 0 : index
    %34 = vector.load %arg3[%c2_23, %c0_24, %c0_25] : memref<3x24x512xf32, #tpu.memory_space<vmem>>, vector<1x24x512xf32>
    %35 = vector.shape_cast %34 : vector<1x24x512xf32> to vector<24x512xf32>
    %cst_26 = arith.constant dense<0.000000e+00> : vector<8x512xf32>
    %36 = tpu.matmul %33, %35, %cst_26 {dimension_numbers = #tpu.dot_dimension_numbers<[1], [0], [0], [1], [0, 0, 1, 1], [], []>} : vector<8x24xf32>, vector<24x512xf32>, vector<8x512xf32> -> vector<8x512xf32>
    %37 = arith.addf %25, %36 : vector<8x512xf32>
    %c0_27 = arith.constant 0 : index
    %c0_28 = arith.constant 0 : index
    %38 = vector.load %arg4[%c0_27, %c0_28] : memref<1x512xf32, #tpu.memory_space<vmem>>, vector<1x512xf32>
    %39 = vector.broadcast %38 : vector<1x512xf32> to vector<8x512xf32>
    %40 = arith.addf %37, %39 : vector<8x512xf32>
    %41 = math.tanh %40 : vector<8x512xf32>
    %cst_29 = arith.constant 5.000000e-01 : f32
    %42 = vector.broadcast %cst_29 : f32 to vector<8x512xf32>
    %43 = arith.mulf %42, %41 : vector<8x512xf32>
    %cst_30 = arith.constant 0.707106769 : f32
    %44 = vector.broadcast %cst_30 : f32 to vector<8x512xf32>
    %45 = arith.mulf %41, %44 : vector<8x512xf32>
    %46 = math.erf %45 : vector<8x512xf32>
    %cst_31 = arith.constant 1.000000e+00 : f32
    %47 = vector.broadcast %cst_31 : f32 to vector<8x512xf32>
    %48 = arith.addf %47, %46 : vector<8x512xf32>
    %49 = arith.mulf %43, %48 : vector<8x512xf32>
    %c0_32 = arith.constant 0 : index
    %c0_33 = arith.constant 0 : index
    %50 = vector.load %arg5[%c0_32, %c0_33] : memref<512x128xf32, #tpu.memory_space<vmem>>, vector<512x128xf32>
    %cst_34 = arith.constant dense<0.000000e+00> : vector<8x128xf32>
    %51 = tpu.matmul %49, %50, %cst_34 {dimension_numbers = #tpu.dot_dimension_numbers<[1], [0], [0], [1], [0, 0, 1, 1], [], []>} : vector<8x512xf32>, vector<512x128xf32>, vector<8x128xf32> -> vector<8x128xf32>
    %c0_35 = arith.constant 0 : index
    %c0_36 = arith.constant 0 : index
    %52 = vector.load %arg6[%c0_35, %c0_36] : memref<1x128xf32, #tpu.memory_space<vmem>>, vector<1x128xf32>
    %53 = vector.broadcast %52 : vector<1x128xf32> to vector<8x128xf32>
    %54 = arith.addf %51, %53 : vector<8x128xf32>
    %c0_37 = arith.constant 0 : index
    %c0_38 = arith.constant 0 : index
    %55 = vector.load %arg7[%c0_37, %c0_38] : memref<8x128xf32, #tpu.memory_space<vmem>>, vector<8x128xf32>
    tpu.vector_store %arg7[%c0_37, %c0_38], %54 {strides = array<i32>} : memref<8x128xf32, #tpu.memory_space<vmem>>, vector<8x128xf32>,
    %c27_i32 = arith.constant 27 : i32
    %56 = vector.broadcast %c27_i32 : i32 to vector<8x128xi32>
    %57 = arith.cmpi slt, %0, %56 : vector<8x128xi32>
    %cst_39 = arith.constant -1.000000e+30 : f32
    %58 = vector.broadcast %cst_39 : f32 to vector<8x128xf32>
    %59 = arith.select %57, %54, %58 : vector<8x128xi1>, vector<8x128xf32>
    %cst_40 = arith.constant dense<0xFF800000> : vector<8xf32>
    %60 = vector.multi_reduction <maximumf>, %59, %cst_40 [1] : vector<8x128xf32> to vector<8xf32>
    %61 = vector.shape_cast %60 : vector<8xf32> to vector<8x1xf32>
    %62 = vector.broadcast %61 : vector<8x1xf32> to vector<8x128xf32>
    %63 = arith.subf %59, %62 : vector<8x128xf32>
    %64 = math.exp %63 : vector<8x128xf32>
    %cst_41 = arith.constant dense<0.000000e+00> : vector<8xf32>
    %65 = vector.multi_reduction <add>, %64, %cst_41 [1] : vector<8x128xf32> to vector<8xf32>
    %66 = vector.shape_cast %65 : vector<8xf32> to vector<8x1xf32>
    %67 = math.log %66 : vector<8x1xf32>
    %68 = vector.broadcast %67 : vector<8x1xf32> to vector<8x128xf32>
    %69 = arith.subf %63, %68 : vector<8x128xf32>
    %c0_42 = arith.constant 0 : index
    %c0_43 = arith.constant 0 : index
    %70 = vector.load %arg1[%c0_42, %c0_43] : memref<8x1xi32, #tpu.memory_space<vmem>>, vector<8x1xi32>
    %71 = vector.broadcast %70 : vector<8x1xi32> to vector<8x128xi32>
    %72 = arith.cmpi eq, %71, %0 : vector<8x128xi32>
    %73 = arith.extui %72 : vector<8x128xi1> to vector<8x128xi32>
    %74 = arith.sitofp %73 : vector<8x128xi32> to vector<8x128xf32>
    %75 = arith.mulf %74, %69 : vector<8x128xf32>
    %cst_44 = arith.constant dense<0.000000e+00> : vector<8xf32>
    %76 = vector.multi_reduction <add>, %75, %cst_44 [1] : vector<8x128xf32> to vector<8xf32>
    %77 = vector.shape_cast %76 : vector<8xf32> to vector<8x1xf32>
    %cst_45 = arith.constant 0.000000e+00 : f32
    %78 = vector.broadcast %cst_45 : f32 to vector<8x1xf32>
    %79 = arith.subf %78, %77 : vector<8x1xf32>
    %cst_46 = arith.constant dense<0.000000e+00> : vector<1xf32>
    %80 = vector.multi_reduction <add>, %79, %cst_46 [0] : vector<8x1xf32> to vector<1xf32>
    %81 = vector.shape_cast %80 : vector<1xf32> to vector<1x1xf32>
    %cst_47 = arith.constant 1.250000e-01 : f32
    %82 = vector.broadcast %cst_47 : f32 to vector<1x1xf32>
    %83 = arith.mulf %81, %82 : vector<1x1xf32>
    %c0_48 = arith.constant 0 : index
    %c0_49 = arith.constant 0 : index
    %84 = vector.load %arg8[%c0_48, %c0_49] : memref<1x1xf32, #tpu.memory_space<vmem>>, vector<1x1xf32>
    tpu.vector_store %arg8[%c0_48, %c0_49], %83 {strides = array<i32>} : memref<1x1xf32, #tpu.memory_space<vmem>>, vector<1x1xf32>,
    return
  }
}

</mosaic_0001>

<bundles_post_ra>
// kernel: mlp_forward.1
= control target key start
LH: loop header
LB: loop body
LE: loop exit
PB: predicated region body
PF: predicated region fallthrough
CT: control target
= control target key end

     0   :  { %14 = vsyncpa [#allocation3], 0  ;;  %v1592_v2 = vmov 0   ;;  %v1593_v9 = vmov 0.0|0.0   ;;  %vm1594_vm0 = vmmov 0   ;;  %v1595_v13 = vmov 0.0   ;;  %s2101_s0 = inlined_call_operand.vmem [shape: s32[3,8,1], index: 0, kind: input, shape index: {}]   ;;  %s2102_s1 = inlined_call_operand.vmem [shape: s32[8,1], index: 1, kind: input, shape index: {}]   ;;  %s2103_s2 = inlined_call_operand.vmem [shape: f32[128,24], index: 2, kind: input, shape index: {}]   ;;  %s2104_s3 = inlined_call_operand.vmem [shape: f32[3,24,512], index: 3, kind: input, shape index: {}]   ;;  %s2105_s4 = inlined_call_operand.vmem [shape: f32[1,512], index: 4, kind: input, shape index: {}]   ;;  %s2106_s5 = inlined_call_operand.vmem [shape: f32[512,128], index: 5, kind: input, shape index: {}]   ;;  %s2107_s6 = inlined_call_operand.vmem [shape: f32[1,128], index: 6, kind: input, shape index: {}]   ;;  %s2108_s7 = inlined_call_operand.hbm [shape: f32[8,128], index: 7, kind: output, shape index: {0}]   ;;  %s2109_s8 = inlined_call_operand.hbm [shape: f32[1,1], index: 8, kind: output, shape index: {1}]  }
   0x1   :  { %v32_v0 = vld [vmem:[%s2101_s0] sm:$0xff]  ;;  %v1102_v1 = vld [vmem:[%s2101_s0 + $0x10] sm:$0xff]  ;;  %1522 = vset.pattern.permute.xlu0 %v1592_v2  ;;  %1523 = vset.pattern.permute.xlu1 %v1592_v2  ;;  %v40_v4 = vld [vmem:[%s2103_s2 + $0x8] sm:$0xff] }
   0x2   :  { %v39_v3 = vld [vmem:[%s2103_s2] sm:$0xff]  ;;  %v41_v5 = vld [vmem:[%s2103_s2 + $0x10] sm:$0xff]  ;;  %34 = vperm.xlu0 %1522, %v32_v0   ;;  %522 = vperm.xlu1 %1523, %v1102_v1   ;;  %v42_v7 = vld [vmem:[%s2103_s2 + $0x18] sm:$0xff] }
   0x3   :  { %v1659_v6 = vpack.c.bf16 %v40_v4, %v39_v3  ;;  %v1083_v8 = vld [vmem:[%s2101_s0 + $0x8] sm:$0xff]  ;;  %1347 = vmatprep.subr.bf16.mxu0 %v1593_v9  ;;  %1371 = vmatprep.subr.bf16.mxu1 %v1593_v9  ;;  %v1670_v10 = vpack.c.bf16 %v42_v7, %v41_v5  ;;  %v43_v11 = vld [vmem:[%s2103_s2 + $0x20] sm:$0xff] }
   0x4   :  { %v44_v12 = vld [vmem:[%s2103_s2 + $0x28] sm:$0xff]  ;;  %1274 = vmatprep.mubr.msk.f32.mxu0 %vm1594_vm0, %v1595_v13 }
   0x5   :  { %1349 = vmatpush3.bf16.msra.mxu0 %v1659_v6  ;;  %1373 = vmatpush3.bf16.msra.mxu1 %v1659_v6 }
   0x6   :  { %1350 = vmatprep.subr.bf16.mxu0 %v1593_v9  ;;  %1374 = vmatprep.subr.bf16.mxu1 %v1593_v9 }
   0x7   :  { %140 = vperm.xlu0 %1522, %v1083_v8  }
   0x8   :  { %15 = vsyncpa [#allocation5], 0  ;;  %1309 = vmatprep.mubr.msk.f32.mxu1 %vm1594_vm0, %v1595_v13  ;;  %v1686_v14 = vpack.c.bf16 %v44_v12, %v43_v11  ;;  %v45_v15 = vld [vmem:[%s2103_s2 + $0x30] sm:$0xff]  ;;  %v46_v16 = vld [vmem:[%s2103_s2 + $0x38] sm:$0xff]  ;;  %v30_v33 = vlaneseq  ;;  %v1596_v38 = vmov 1.0   ;;  %vm228_vm4 = vcmask 195584  }
   0x9   :  { %1352 = vmatpush3.bf16.msra.mxu0 %v1670_v10  ;;  %1376 = vmatpush3.bf16.msra.mxu1 %v1670_v10  ;;  %v1357_v17 = vpack.c.bf16 %v46_v16, %v45_v15  ;;  %v47_v18 = vld [vmem:[%s2103_s2 + $0x40] sm:$0xff]  ;;  %v48_v19 = vld [vmem:[%s2103_s2 + $0x48] sm:$0xff]  ;;  %v49_v21 = vld [vmem:[%s2103_s2 + $0x50] sm:$0xff] }
   0xa   :  { %1353 = vmatprep.subr.bf16.mxu0 %v1593_v9  ;;  %1377 = vmatprep.subr.bf16.mxu1 %v1593_v9  ;;  %v1360_v20 = vpack.c.bf16 %v48_v19, %v47_v18  ;;  %v50_v22 = vld [vmem:[%s2103_s2 + $0x58] sm:$0xff]  ;;  %v51_v24 = vld [vmem:[%s2103_s2 + $0x60] sm:$0xff]  ;;  %v52_v25 = vld [vmem:[%s2103_s2 + $0x68] sm:$0xff]  ;;  %v1741_v34 = vand.u32 127, %v30_v33 }
   0xb   :  { %v1363_v23 = vpack.c.bf16 %v50_v22, %v49_v21  ;;  %v1366_v26 = vpack.c.bf16 %v52_v25, %v51_v24  ;;  %v53_v27 = vld [vmem:[%s2103_s2 + $0x70] sm:$0xff]  ;;  %v54_v28 = vld [vmem:[%s2103_s2 + $0x78] sm:$0xff]  ;;  %v1087_v30 = vld [vmem:[%s2104_s3 + $0x68] sm:$0xff] }
   0xc   :  { %v1369_v29 = vpack.c.bf16 %v54_v28, %v53_v27  ;;  %v1091_v31 = vld [vmem:[%s2104_s3 + $0x88] sm:$0xff]  ;;  %v1086_v36 = vld [vmem:[%s2104_s3 + $0x60] sm:$0xff]  ;;  %v1089_v44 = vld [vmem:[%s2104_s3 + $0x78] sm:$0xff]  ;;  %vm1021_vm5 = vcmp.lt.s32.totalorder %v1741_v34, 27 }
   0xd   :  { %1355 = vmatpush3.bf16.msra.mxu0 %v1686_v14  ;;  %1379 = vmatpush3.bf16.msra.mxu1 %v1686_v14  ;;  %v1395_v32 = vpack.c.bf16 %v1091_v31, %v1087_v30  ;;  %v1090_v37 = vld [vmem:[%s2104_s3 + $0x80] sm:$0xff]  ;;  %v1095_v42 = vld [vmem:[%s2104_s3 + $0xa8] sm:$0xff]  ;;  %v1093_v45 = vld [vmem:[%s2104_s3 + $0x98] sm:$0xff] }
   0xe   :  { %1356 = vmatprep.subr.bf16.mxu0 %v1593_v9  ;;  %1380 = vmatprep.subr.bf16.mxu1 %v1593_v9  ;;  %v1397_v39 = vpack.c.bf16 %v1090_v37, %v1086_v36  ;;  %v1094_v43 = vld [vmem:[%s2104_s3 + $0xa0] sm:$0xff]  ;;  %v1399_v46 = vpack.c.bf16 %v1093_v45, %v1089_v44  ;;  %v1088_v47 = vld [vmem:[%s2104_s3 + $0x70] sm:$0xff]  ;;  %v1097_v53 = vld [vmem:[%s2104_s3 + $0xb8] sm:$0xff] }
   0xf   :  { %v1092_v48 = vld [vmem:[%s2104_s3 + $0x90] sm:$0xff]  ;;  %v126_v54 = vld [vmem:[%s2104_s3 + $0x8] sm:$0xff]  ;;  %v125_v57 = vld [vmem:[%s2104_s3] sm:$0xff] }
  0x10   :  { %v1401_v51 = vpack.c.bf16 %v1092_v48, %v1088_v47  ;;  %v130_v55 = vld [vmem:[%s2104_s3 + $0x28] sm:$0xff]  ;;  %v129_v58 = vld [vmem:[%s2104_s3 + $0x20] sm:$0xff]  ;;  %v1096_v59 = vld [vmem:[%s2104_s3 + $0xb0] sm:$0xff] }
  0x11   :  { %1358 = vmatpush3.bf16.msra.mxu0 %v1357_v17  ;;  %1382 = vmatpush3.bf16.msra.mxu1 %v1357_v17  ;;  %v1403_v60 = vpack.c.bf16 %v130_v55, %v126_v54  ;;  %v1405_v61 = vpack.c.bf16 %v129_v58, %v125_v57  ;;  %v134_v62 = vld [vmem:[%s2104_s3 + $0x48] sm:$0xff]  ;;  %v128_v63 = vld [vmem:[%s2104_s3 + $0x18] sm:$0xff]  ;;  %v127_v1 = vld [vmem:[%s2104_s3 + $0x10] sm:$0xff] }
  0x12   :  { %1359 = vmatprep.subr.bf16.mxu0 %v1593_v9  ;;  %1383 = vmatprep.subr.bf16.mxu1 %v1593_v9  ;;  %v132_v0 = vld [vmem:[%s2104_s3 + $0x38] sm:$0xff]  ;;  %v131_v2 = vld [vmem:[%s2104_s3 + $0x30] sm:$0xff]  ;;  %v133_v3 = vld [vmem:[%s2104_s3 + $0x40] sm:$0xff] }
  0x13   :  { %v1407_v4 = vpack.c.bf16 %v132_v0, %v128_v63  ;;  %v1409_v5 = vpack.c.bf16 %v131_v2, %v127_v1  ;;  %v1106_v7 = vld [vmem:[%s2104_s3 + $0xc8] sm:$0xff]  ;;  %v135_v11 = vld [vmem:[%s2104_s3 + $0x50] sm:$0xff]  ;;  %v1108_v16 = vld [vmem:[%s2104_s3 + $0xd8] sm:$0xff] }
  0x14   :  { %v1110_v8 = vld [vmem:[%s2104_s3 + $0xe8] sm:$0xff]  ;;  %v1113_v18 = vld [vmem:[%s2104_s3 + $0x100] sm:$0xff]  ;;  %v1111_v21 = vld [vmem:[%s2104_s3 + $0xf0] sm:$0xff] }
  0x15   :  { %1361 = vmatpush3.bf16.msra.mxu0 %v1360_v20  ;;  %1385 = vmatpush3.bf16.msra.mxu1 %v1360_v20  ;;  %v1435_v12 = vpack.c.bf16 %v1110_v8, %v1106_v7  ;;  %v1114_v15 = vld [vmem:[%s2104_s3 + $0x108] sm:$0xff]  ;;  %v1116_v24 = vld [vmem:[%s2104_s3 + $0x118] sm:$0xff]  ;;  %v825_v27 = vld [vmem:[%s2106_s5 + $0x80] sm:$0xff] }
  0x16   :  { %1362 = vmatprep.subr.bf16.mxu0 %v1593_v9  ;;  %1386 = vmatprep.subr.bf16.mxu1 %v1593_v9  ;;  %v826_v28 = vld [vmem:[%s2106_s5 + $0x88] sm:$0xff]  ;;  %v809_v30 = vld [vmem:[%s2106_s5] sm:$0xff]  ;;  %v828_v36 = vld [vmem:[%s2106_s5 + $0x98] sm:$0xff] }
  0x17   :  { %v810_v31 = vld [vmem:[%s2106_s5 + $0x8] sm:$0xff]  ;;  %v829_v47 = vld [vmem:[%s2106_s5 + $0xa0] sm:$0xff]  ;;  %v860_v54 = vld [vmem:[%s2106_s5 + $0x198] sm:$0xff] }
  0x18   :  { %v842_v44 = vld [vmem:[%s2106_s5 + $0x108] sm:$0xff]  ;;  %v843_v55 = vld [vmem:[%s2106_s5 + $0x110] sm:$0xff]  ;;  %v816_v63 = vld [vmem:[%s2106_s5 + $0x38] sm:$0xff] }
  0x19   :  { %1364 = vmatpush3.bf16.msra.mxu0 %v1363_v23  ;;  %1388 = vmatpush3.bf16.msra.mxu1 %v1363_v23  ;;  %v830_v48 = vld [vmem:[%s2106_s5 + $0xa8] sm:$0xff]  ;;  %v861_v0 = vld [vmem:[%s2106_s5 + $0x1a0] sm:$0xff] }
  0x1a   :  { %1365 = vmatprep.subr.bf16.mxu0 %v1593_v9  ;;  %1389 = vmatprep.subr.bf16.mxu1 %v1593_v9  ;;  %v862_v2 = vld [vmem:[%s2106_s5 + $0x1a8] sm:$0xff]  ;;  %v833_v7 = vld [vmem:[%s2106_s5 + $0xc0] sm:$0xff] }
  0x1b   :  { %v834_v8 = vld [vmem:[%s2106_s5 + $0xc8] sm:$0xff] }
  0x1d   :  { %1367 = vmatpush3.bf16.msra.mxu0 %v1366_v26  ;;  %1391 = vmatpush3.bf16.msra.mxu1 %v1366_v26 }
  0x1e   :  { %1368 = vmatprep.subr.bf16.mxu0 %v1593_v9  ;;  %1392 = vmatprep.subr.bf16.mxu1 %v1593_v9 }
  0x21   :  { %1370 = vmatpush3.bf16.msra.mxu0 %v1369_v29  ;;  %1394 = vmatpush3.bf16.msra.mxu1 %v1369_v29 }
  0x22   :  { %1411 = vmatprep.subr.bf16.mxu0 %v1593_v9  ;;  %1396 = vmatprep.subr.bf16.mxu1 %v1395_v32  ;;  %v1445_v32 = vpack.c.bf16 %v810_v31, %v809_v30 }
  0x81   :  { %v35_v35 = vpop.permute.xlu0 %34  ;;  %v523_v41 = vpop.permute.xlu1 %522 }
  0x82   :  { %vm36_vm1 = vcmp.eq.s32.totalorder %v35_v35, %v1741_v34  ;;  %vm524_vm3 = vcmp.eq.s32.totalorder %v523_v41, %v1741_v34  ;;  %v827_v35 = vld [vmem:[%s2106_s5 + $0x90] sm:$0xff] }
  0x83   :  { %1275 = vmatmul.mubr.msk.f32.vlgmr.msra.gmra.mrb[0].mxu0 %vm36_vm1, %v1596_v38  ;;  %v1447_v37 = vpack.c.bf16 %v828_v36, %v827_v35  ;;  %v838_v35 = vld [vmem:[%s2106_s5 + $0xe8] sm:$0xff]  ;;  %v821_v36 = vld [vmem:[%s2106_s5 + $0x60] sm:$0xff] }
  0x84   :  { %1413 = vmatpush3.bf16.msra.mxu0 %v1659_v6  ;;  %1344 = vmatprep.mubr.msk.f32.mxu0 %vm1594_vm0, %v1595_v13  ;;  %v136_v6 = vld [vmem:[%s2104_s3 + $0x58] sm:$0xff] }
  0x85   :  { %1414 = vmatprep.subr.bf16.mxu0 %v1593_v9 }
  0x86   :  { %v141_v40 = vpop.permute.xlu0 %140 }
  0x87   :  { %vm142_vm2 = vcmp.eq.s32.totalorder %v141_v40, %v1741_v34  ;;  %v857_v40 = vld [vmem:[%s2106_s5 + $0x180] sm:$0xff] }
  0x88   :  { %1310 = vmatmul.mubr.msk.f32.vlgmr.msra.gmra.mrb[0].mxu1 %vm142_vm2, %v1596_v38  ;;  %1416 = vmatpush3.bf16.msra.mxu0 %v1670_v10  ;;  %v1109_v10 = vld [vmem:[%s2104_s3 + $0xe0] sm:$0xff] }
  0x89   :  { %1398 = vmatpush1.bf16.msra.mxu1 %v1397_v39  ;;  %1417 = vmatprep.subr.bf16.mxu0 %v1593_v9  ;;  %v812_v39 = vld [vmem:[%s2106_s5 + $0x18] sm:$0xff] }
  0x8a   :  { %296 = vmatprep.mubr.f32.mxu1 %v1595_v13  ;;  %236 = vmatprep.subr.mxu1 %v1095_v42  ;;  %v858_v42 = vld [vmem:[%s2106_s5 + $0x188] sm:$0xff] }
  0x8b   :  { %v1475_v45 = vpack.c.bf16 %v858_v42, %v857_v40  ;;  %v868_v40 = vld [vmem:[%s2106_s5 + $0x1d8] sm:$0xff] }
  0x8c   :  { %1419 = vmatpush3.bf16.msra.mxu0 %v1686_v14 }
  0x8d   :  { %1420 = vmatprep.subr.bf16.mxu0 %v1593_v9  ;;  %237 = vmatpush1.msra.mxu1 %v1094_v43  ;;  %v841_v43 = vld [vmem:[%s2106_s5 + $0x100] sm:$0xff] }
  0x8e   :  { %1400 = vmatprep.subr.bf16.mxu1 %v1399_v46  ;;  %v1477_v46 = vpack.c.bf16 %v842_v44, %v841_v43  ;;  %v851_v43 = vld [vmem:[%s2106_s5 + $0x150] sm:$0xff]  ;;  %v852_v44 = vld [vmem:[%s2106_s5 + $0x158] sm:$0xff] }
  0x90   :  { %1422 = vmatpush3.bf16.msra.mxu0 %v1357_v17  ;;  %v1112_v17 = vld [vmem:[%s2104_s3 + $0xf8] sm:$0xff] }
  0x91   :  { %1423 = vmatprep.subr.bf16.mxu0 %v1593_v9  ;;  %v1439_v19 = vpack.c.bf16 %v1112_v17, %v1108_v16  ;;  %v847_v16 = vld [vmem:[%s2106_s5 + $0x130] sm:$0xff]  ;;  %v848_v17 = vld [vmem:[%s2106_s5 + $0x138] sm:$0xff] }
  0x94   :  { %1425 = vmatpush3.bf16.msra.mxu0 %v1360_v20  ;;  %v1107_v20 = vld [vmem:[%s2104_s3 + $0xd0] sm:$0xff] }
  0x95   :  { %1426 = vmatprep.subr.bf16.mxu0 %v1593_v9  ;;  %v1441_v22 = vpack.c.bf16 %v1111_v21, %v1107_v20  ;;  %v835_v20 = vld [vmem:[%s2106_s5 + $0xd0] sm:$0xff]  ;;  %v836_v21 = vld [vmem:[%s2106_s5 + $0xd8] sm:$0xff] }
  0x98   :  { %1428 = vmatpush3.bf16.msra.mxu0 %v1363_v23 }
  0x99   :  { %1429 = vmatprep.subr.bf16.mxu0 %v1593_v9 }
  0x9c   :  { %1431 = vmatpush3.bf16.msra.mxu0 %v1366_v26  ;;  %v1115_v26 = vld [vmem:[%s2104_s3 + $0x110] sm:$0xff] }
  0x9d   :  { %1432 = vmatprep.subr.bf16.mxu0 %v1593_v9  ;;  %v1105_v9 = vld [vmem:[%s2104_s3 + $0xc0] sm:$0xff] }
  0x9e   :  { %v1437_v14 = vpack.c.bf16 %v1109_v10, %v1105_v9  ;;  %v1459_v9 = vpack.c.bf16 %v834_v8, %v833_v7  ;;  %v817_v10 = vld [vmem:[%s2106_s5 + $0x40] sm:$0xff] }
  0xa0   :  { %1434 = vmatpush3.bf16.msra.mxu0 %v1369_v29  ;;  %v1443_v29 = vpack.c.bf16 %v826_v28, %v825_v27  ;;  %v866_v27 = vld [vmem:[%s2106_s5 + $0x1c8] sm:$0xff]  ;;  %v849_v28 = vld [vmem:[%s2106_s5 + $0x140] sm:$0xff] }
  0xa1   :  { %1476 = vmatprep.subr.bf16.mxu0 %v1475_v45  ;;  %v839_v45 = vld [vmem:[%s2106_s5 + $0xf0] sm:$0xff] }
  0xa3   :  { %1345 = vmatmul.mubr.msk.f32.vlgmr.msra.gmra.mrb[2].mxu0 %vm524_vm3, %v1596_v38  ;;  %v811_v38 = vld [vmem:[%s2106_s5 + $0x10] sm:$0xff] }
  0xa4   :  { %v1449_v41 = vpack.c.bf16 %v812_v39, %v811_v38  ;;  %1478 = vmatpush3.bf16.msra.mxu0 %v1477_v46  ;;  %v822_v38 = vld [vmem:[%s2106_s5 + $0x68] sm:$0xff]  ;;  %v867_v39 = vld [vmem:[%s2106_s5 + $0x1d0] sm:$0xff]  ;;  %v1497_v46 = vpack.c.bf16 %v852_v44, %v851_v43 }
  0xa5   :  { %v1495_v42 = vpack.c.bf16 %v868_v40, %v867_v39 }
 0x156   :  { %v121_v49 = vpop.f32.mrb[0].mxu0 }
 0x157   :  { %v1276_v50 = vpop.f32.mrb[1].mxu0 }
 0x158   :  { %v813_v50 = vld [vmem:[%s2106_s5 + $0x20] sm:$0xff] }
 0x15b   :  { %v211_v52 = vpop.f32.mrb[0].mxu1 }
 0x15c   :  { %v1311_v56 = vpop.f32.mrb[1].mxu1  ;;  %1098 = vmatmul.mubr.msk.f32.vlgmr.msra.gmra.mrb[2].mxu1 %vm228_vm4, %v211_v52 }
 0x15d   :  { %1402 = vmatpush1.bf16.msra.mxu1 %v1401_v51  ;;  %367 = vmatprep.mubr.f32.mxu1 %v1595_v13  ;;  %v814_v51 = vld [vmem:[%s2106_s5 + $0x28] sm:$0xff]  ;;  %v844_v56 = vld [vmem:[%s2106_s5 + $0x118] sm:$0xff] }
 0x15e   :  { %307 = vmatprep.subr.mxu1 %v1097_v53  ;;  %v1453_v53 = vpack.c.bf16 %v814_v51, %v813_v50  ;;  %v1481_v58 = vpack.c.bf16 %v844_v56, %v843_v55  ;;  %v869_v51 = vld [vmem:[%s2106_s5 + $0x1e0] sm:$0xff]  ;;  %v854_v56 = vld [vmem:[%s2106_s5 + $0x168] sm:$0xff] }
 0x161   :  { %308 = vmatpush1.msra.mxu1 %v1096_v59  ;;  %v831_v59 = vld [vmem:[%s2106_s5 + $0xb0] sm:$0xff] }
 0x162   :  { %1099 = vmatmul.mubr.msk.f32.vlgmr.msra.gmra.mrb[4].mxu1 %vm228_vm4, %v211_v52  ;;  %1404 = vmatprep.subr.bf16.mxu1 %v1403_v60  ;;  %v859_v52 = vld [vmem:[%s2106_s5 + $0x190] sm:$0xff]  ;;  %v832_v60 = vld [vmem:[%s2106_s5 + $0xb8] sm:$0xff] }
 0x163   :  { %1406 = vmatpush1.bf16.msra.mxu1 %v1405_v61  ;;  %441 = vmatprep.mubr.f32.mxu1 %v1595_v13  ;;  %v1479_v57 = vpack.c.bf16 %v860_v54, %v859_v52  ;;  %v1455_v61 = vpack.c.bf16 %v832_v60, %v831_v59  ;;  %v870_v52 = vld [vmem:[%s2106_s5 + $0x1e8] sm:$0xff]  ;;  %v872_v59 = vld [vmem:[%s2106_s5 + $0x1f8] sm:$0xff] }
 0x164   :  { %381 = vmatprep.subr.mxu1 %v134_v62  ;;  %v815_v62 = vld [vmem:[%s2106_s5 + $0x30] sm:$0xff]  ;;  %v1499_v55 = vpack.c.bf16 %v870_v52, %v869_v51 }
 0x165   :  { %1480 = vmatprep.subr.bf16.mxu0 %v1479_v57  ;;  %v1457_v1 = vpack.c.bf16 %v816_v63, %v815_v62  ;;  %v856_v62 = vld [vmem:[%s2106_s5 + $0x178] sm:$0xff] }
 0x166   :  { %1482 = vmatpush3.bf16.msra.mxu0 %v1481_v58  ;;  %v871_v58 = vld [vmem:[%s2106_s5 + $0x1f0] sm:$0xff] }
 0x167   :  { %382 = vmatpush1.msra.mxu1 %v133_v3  ;;  %v845_v3 = vld [vmem:[%s2106_s5 + $0x120] sm:$0xff]  ;;  %v1503_v60 = vpack.c.bf16 %v872_v59, %v871_v58 }
 0x168   :  { %1100 = vmatmul.mubr.msk.f32.vlgmr.msra.gmra.mrb[2].mxu1 %vm228_vm4, %v121_v49  ;;  %1408 = vmatprep.subr.bf16.mxu1 %v1407_v4  ;;  %v846_v4 = vld [vmem:[%s2106_s5 + $0x128] sm:$0xff]  ;;  %v1033_v58 = vld [vmem:[%s2102_s1] sm:$0xff] }
 0x169   :  { %1410 = vmatpush1.bf16.msra.mxu1 %v1409_v5  ;;  %512 = vmatprep.mubr.f32.mxu1 %v1595_v13  ;;  %v1483_v5 = vpack.c.bf16 %v862_v2, %v861_v0  ;;  %v762_v0 = vshrl.u32 %v30_v33, 7  ;;  %v759_v2 = vld [vmem:[%s2105_s4] sm:$0xf] }
 0x16a   :  { %452 = vmatprep.subr.mxu1 %v136_v6  ;;  %v1485_v6 = vpack.c.bf16 %v846_v4, %v845_v3 }
 0x16b   :  { %1484 = vmatprep.subr.bf16.mxu0 %v1483_v5  ;;  %v767_v3 = vsub.s32 1, %v762_v0  ;;  %v775_v8 = vsub.s32 3, %v762_v0 }
 0x16c   :  { %1486 = vmatpush3.bf16.msra.mxu0 %v1485_v6  ;;  %v771_v6 = vsub.s32 2, %v762_v0 }
 0x16d   :  { %453 = vmatpush1.msra.mxu1 %v135_v11  ;;  %v818_v11 = vld [vmem:[%s2106_s5 + $0x48] sm:$0xff]  ;;  %v768_v5 = vrot.slane %v759_v2, %v767_v3 }
 0x16e   :  { %1101 = vmatmul.mubr.msk.f32.vlgmr.msra.gmra.mrb[4].mxu1 %vm228_vm4, %v121_v49  ;;  %1436 = vmatprep.subr.bf16.mxu1 %v1435_v12  ;;  %v1451_v49 = vpack.c.bf16 %v830_v48, %v829_v47  ;;  %v863_v12 = vld [vmem:[%s2106_s5 + $0x1b0] sm:$0xff]  ;;  %v840_v47 = vld [vmem:[%s2106_s5 + $0xf8] sm:$0xff] }
 0x16f   :  { %1438 = vmatpush1.bf16.msra.mxu1 %v1437_v14  ;;  %677 = vmatprep.mubr.f32.mxu1 %v1595_v13  ;;  %v1461_v14 = vpack.c.bf16 %v818_v11, %v817_v10  ;;  %v823_v48 = vld [vmem:[%s2106_s5 + $0x70] sm:$0xff]  ;;  %v1471_v50 = vpack.c.bf16 %v840_v47, %v839_v45  ;;  %v1119_v47 = vld [vmem:[%s2107_s6] ss:$0 sm:$0xff]  ;;  %s1597_s6 = smov [#allocation2]  }
 0x170   :  { %617 = vmatprep.subr.mxu1 %v1114_v15  ;;  %v864_v15 = vld [vmem:[%s2106_s5 + $0x1b8] sm:$0xff]  ;;  %s1059_s25 = sshll.u32 %s1597_s6, 4  ;;  %s1060_s25 = int_to_ptr.vmem [resolvable:$true] %s1059_s25 }
 0x171   :  { %s1544_s3 = scalar_lea.vmem %s1060_s25, 128  ;;  %p1549_p1 = scmp.lt.s32.totalorder %s1060_s25, %s1060_s25 }
 0x172   :  { %p1545_p0 = scmp.ne.s32.totalorder %s1060_s25, %s1544_s3  ;;  %p1550_p2 = scmp.lt.s32.totalorder %s1544_s3, %s1544_s3 }
 0x173   :  { %618 = vmatpush1.msra.mxu1 %v1113_v18  ;;  %v1487_v18 = vpack.c.bf16 %v864_v15, %v863_v12  ;;  %v772_v12 = vrot.slane %v759_v2, %v771_v6 }
 0x174   :  { %1440 = vmatprep.subr.bf16.mxu1 %v1439_v19  ;;  %v1489_v19 = vpack.c.bf16 %v848_v17, %v847_v16  ;;  %p1551_p3 = por %p1550_p2, %p1549_p1 }
 0x175   :  { %1488 = vmatprep.subr.bf16.mxu0 %v1487_v18 }
 0x176   :  { %v593_v23 = vpop.f32.mrb[2].mxu0  ;;  %1490 = vmatpush3.bf16.msra.mxu0 %v1489_v19  ;;  %p1552_p4 = pnand %p1551_p3, %p1545_p0 }
 0x177   :  { %v1346_v25 = vpop.f32.mrb[3].mxu0  ;;  %1117 = vmatmul.mubr.msk.f32.vlgmr.msra.gmra.mrb[2].mxu1 %vm228_vm4, %v593_v23 }
 0x178   :  { %1442 = vmatpush1.bf16.msra.mxu1 %v1441_v22  ;;  %748 = vmatprep.mubr.f32.mxu1 %v1595_v13  ;;  %v1463_v22 = vpack.c.bf16 %v836_v21, %v835_v20  ;;  %v865_v25 = vld [vmem:[%s2106_s5 + $0x1c0] sm:$0xff] }
 0x179   :  { %688 = vmatprep.subr.mxu1 %v1116_v24  ;;  %v820_v24 = vld [vmem:[%s2106_s5 + $0x58] sm:$0xff]  ;;  %v1491_v30 = vpack.c.bf16 %v866_v27, %v865_v25 }
 0x17b   :  { %1492 = vmatprep.subr.bf16.mxu0 %v1491_v30 }
 0x17c   :  { %689 = vmatpush1.msra.mxu1 %v1115_v26 }
 0x17d   :  { %1118 = vmatmul.mubr.msk.f32.vlgmr.msra.gmra.mrb[4].mxu1 %vm228_vm4, %v593_v23  ;;  %1444 = vmatprep.subr.bf16.mxu1 %v1443_v29  ;;  %v819_v23 = vld [vmem:[%s2106_s5 + $0x50] sm:$0xff]  ;;  %v850_v29 = vld [vmem:[%s2106_s5 + $0x148] sm:$0xff] }
 0x17e   :  { %1446 = vmatpush3.bf16.msra.mxu1 %v1445_v32  ;;  %v1465_v26 = vpack.c.bf16 %v820_v24, %v819_v23  ;;  %v1493_v31 = vpack.c.bf16 %v850_v29, %v849_v28  ;;  %v837_v32 = vld [vmem:[%s2106_s5 + $0xe0] sm:$0xff] }
 0x17f   :  { %1448 = vmatprep.subr.bf16.mxu1 %v1447_v37  ;;  %v1467_v37 = vpack.c.bf16 %v838_v35, %v837_v32 }
 0x180   :  { %1494 = vmatpush3.bf16.msra.mxu0 %v1493_v31 }
 0x181   :  { %1496 = vmatprep.subr.bf16.mxu0 %v1495_v42 }
 0x182   :  { %1450 = vmatpush3.bf16.msra.mxu1 %v1449_v41  ;;  %v1469_v41 = vpack.c.bf16 %v822_v38, %v821_v36 }
 0x183   :  { %1452 = vmatprep.subr.bf16.mxu1 %v1451_v49  ;;  %v824_v49 = vld [vmem:[%s2106_s5 + $0x78] sm:$0xff] }
 0x184   :  { %v1473_v54 = vpack.c.bf16 %v824_v49, %v823_v48  ;;  %1498 = vmatpush3.bf16.msra.mxu0 %v1497_v46 }
 0x185   :  { %1500 = vmatprep.subr.bf16.mxu0 %v1499_v55 }
 0x186   :  { %1454 = vmatpush3.bf16.msra.mxu1 %v1453_v53  ;;  %v853_v53 = vld [vmem:[%s2106_s5 + $0x160] sm:$0xff] }
 0x187   :  { %1456 = vmatprep.subr.bf16.mxu1 %v1455_v61  ;;  %v1501_v57 = vpack.c.bf16 %v854_v56, %v853_v53  ;;  %v855_v61 = vld [vmem:[%s2106_s5 + $0x170] sm:$0xff] }
 0x188   :  { %v1505_v63 = vpack.c.bf16 %v856_v62, %v855_v61 }
 0x189   :  { %1502 = vmatpush3.bf16.msra.mxu0 %v1501_v57 }
 0x18a   :  { %1458 = vmatpush3.bf16.msra.mxu1 %v1457_v1  ;;  %1504 = vmatprep.subr.bf16.mxu0 %v1503_v60  ;;  %v763_v1 = vsub.s32 0, %v762_v0 }
 0x18b   :  { %1460 = vmatprep.subr.bf16.mxu1 %v1459_v9 }
 0x18c   :  { %v764_v4 = vrot.slane %v759_v2, %v763_v1 }
 0x18d   :  { %1506 = vmatpush3.bf16.msra.mxu0 %v1505_v63 }
 0x18e   :  { %1462 = vmatpush3.bf16.msra.mxu1 %v1461_v14  ;;  %v776_v14 = vrot.slane %v759_v2, %v775_v8 }
 0x18f   :  { %1464 = vmatprep.subr.bf16.mxu1 %v1463_v22 }
 0x192   :  { %1466 = vmatpush3.bf16.msra.mxu1 %v1465_v26 }
 0x193   :  { %1468 = vmatprep.subr.bf16.mxu1 %v1467_v37 }
 0x196   :  { %1470 = vmatpush3.bf16.msra.mxu1 %v1469_v41 }
 0x197   :  { %1472 = vmatprep.subr.bf16.mxu1 %v1471_v50 }
 0x19a   :  { %1474 = vmatpush3.bf16.msra.mxu1 %v1473_v54 }
 0x24a   :  { %v679_v7 = vpop.f32.mrb[2].mxu1 }
 0x24b   :  { %v781_v9 = vadd.f32 %v764_v4, %v679_v7  ;;  %v681_v10 = vpop.f32.mrb[3].mxu1 }
 0x24c   :  { %v782_v11 = vadd.f32 %v768_v5, %v681_v10 }
 0x24d   :  { %1524 = vtanh.f32 %v781_v9 }
 0x24e   :  { %1526 = vtanh.f32 %v782_v11 }
 0x250   :  { %v750_v15 = vpop.f32.mrb[4].mxu1 }
 0x251   :  { %v783_v33 = vadd.f32 %v772_v12, %v750_v15  ;;  %v752_v16 = vpop.f32.mrb[5].mxu1 }
 0x252   :  { %v784_v17 = vadd.f32 %v776_v14, %v752_v16 }
 0x253   :  { %1528 = vtanh.f32 %v783_v33 }
 0x254   :  { %1530 = vtanh.f32 %v784_v17 }
 0x257   :  { %v1525_v18 = vpop.eup %1524 }
 0x258   :  { %v1527_v19 = vpop.eup %1526  ;;  %v793_v20 = vmul.f32 0.70710677, %v1525_v18  ;;  %v789_v31 = vmul.f32 0.5, %v1525_v18 }
 0x259   :  { %v794_v21 = vmul.f32 0.70710677, %v1527_v19  ;;  %v790_v29 = vmul.f32 0.5, %v1527_v19 }
 0x25a   :  { %1532 = verf.f32 %v793_v20 }
 0x25b   :  { %1534 = verf.f32 %v794_v21 }
 0x25d   :  { %v1529_v22 = vpop.eup %1528 }
 0x25e   :  { %v1531_v23 = vpop.eup %1530  ;;  %v795_v24 = vmul.f32 0.70710677, %v1529_v22  ;;  %v791_v41 = vmul.f32 0.5, %v1529_v22 }
 0x25f   :  { %v796_v25 = vmul.f32 0.70710677, %v1531_v23  ;;  %v792_v39 = vmul.f32 0.5, %v1531_v23 }
 0x260   :  { %1536 = verf.f32 %v795_v24 }
 0x261   :  { %1538 = verf.f32 %v796_v25 }
 0x264   :  { %v1533_v26 = vpop.eup %1532 }
 0x265   :  { %v1535_v27 = vpop.eup %1534  ;;  %v801_v28 = vadd.f32 1.0, %v1533_v26 }
 0x266   :  { %v802_v30 = vadd.f32 1.0, %v1535_v27 }
 0x267   :  { %v805_v35 = vmul.f32 %v801_v28, %v789_v31 }
 0x268   :  { %v806_v32 = vmul.f32 %v802_v30, %v790_v29 }
 0x26a   :  { %v1537_v36 = vpop.eup %1536  ;;  %944 = vmatprep.mubr.f32.mxu1 %v806_v32 }
 0x26b   :  { %v1539_v37 = vpop.eup %1538  ;;  %945 = vmatmul.mubr.f32.vlgmr.msra.gmra.mrb[6].mxu1 %v805_v35  ;;  %v803_v38 = vadd.f32 1.0, %v1537_v36 }
 0x26c   :  { %v804_v40 = vadd.f32 1.0, %v1539_v37 }
 0x26d   :  { %v807_v43 = vmul.f32 %v803_v38, %v791_v41 }
 0x26e   :  { %v808_v42 = vmul.f32 %v804_v40, %v792_v39 }
 0x270   :  { %1014 = vmatprep.mubr.f32.mxu0 %v808_v42 }
 0x271   :  { %1015 = vmatmul.mubr.f32.vlgmr.msra.gmra.mrb[4].mxu0 %v807_v43 }
 0x33e   :  { %v1204_v44 = vpop.f32.mrb[6].mxu1 }
 0x33f   :  { %v1205_v45 = vpop.f32.mrb[7].mxu1 }
 0x340   :  { %v1206_v46 = vadd.f32 %v1205_v45, %v1204_v44 }
 0x342   :  { %v947_v50 = vadd.f32 %v1206_v46, %v1119_v47 }
 0x344   :  { %v1239_v48 = vpop.f32.mrb[4].mxu0 }
 0x345   :  { %v1240_v49 = vpop.f32.mrb[5].mxu0 }
 0x346   :  { %v1241_v51 = vadd.f32 %v1240_v49, %v1239_v48 }
 0x348   :  { %v1017_v52 = vadd.f32 %v1241_v51, %v947_v50 }
 0x34a   :  { %v1022_v53 = vsel %vm1021_vm5, %v1017_v52, -1e+30  ;;  %1020 = vst [vmem:[#allocation2] sm:$0xff] %v1017_v52 }
 0x34b   :  { %1023 = vmax.xlane.f32.xlu1 %v1022_v53 }
 0x3d8   :  { %v1024_v54 = vpop.xlane.xlu1 %1023 }
 0x3d9   :  { %v1025_v55 = vsub.f32 %v1022_v53, %v1024_v54 }
 0x3db   :  { %v1026_v56 = vmul.f32 1.442695, %v1025_v55 }
 0x3dd   :  { %1540 = vpow2.f32 %v1026_v56 }
 0x3e7   :  { %v1541_v57 = vpop.eup %1540 }
 0x3e8   :  { %1028 = vadd.xlane.f32.xlu0 %v1541_v57 }
 0x3fe   :  { %1035 = vperm.xlu0 %1522, %v1033_v58  }
 0x475   :  { %v1029_v59 = vpop.xlane.xlu0 %1028 }
 0x476   :  { %1542 = vlog2.f32 %v1029_v59 }
 0x47d   :  { %v1036_v60 = vpop.permute.xlu0 %1035 }
 0x47e   :  { %vm1037_vm6 = vcmp.eq.s32.totalorder %v1036_v60, %v1741_v34 }
 0x47f   :  { %v1120_v0 = vsel %vm1037_vm6, 1.0, %v1595_v13 }
 0x480   :  { %v1543_v61 = vpop.eup %1542 }
 0x481   :  { %v1031_v62 = vmul.f32 0.6931472, %v1543_v61 }
 0x483   :  { %v1032_v63 = vsub.f32 %v1025_v55, %v1031_v62 }
 0x485   :  { %v1040_v1 = vmul.f32 %v1120_v0, %v1032_v63 }
 0x487   :  { %1041 = vadd.xlane.f32.xlu1 %v1040_v1 }
 0x488   :  { %1555 = shalt.err (!%p1552_p4)
}
 0x489   :  { %s1556_s27 = scalar_lea.hbm %s2108_s7, 128 }
 0x48a   :  { %p1557_p5 = scmp.ne.s32.totalorder %s2108_s7, %s1556_s27  ;;  %p1560_p6 = scmp.lt.u32.totalorder %s1556_s27, %s2108_s7 }
 0x48c   :  { %p1562_p7 = pnand %p1560_p6, %p1557_p5 }
 0x48e   :  { %1565 = shalt.err (!%p1562_p7)
}
 0x48f   :  { %1062 = dma.vmem_to_hbm [thread:$0]  %s1060_s25, 128, %s2108_s7, [#allocation3]   ;;  %vm1051_vm7 = vcmask 0  }
 0x490   :  { %s1598_s12 = smov [#allocation4]  }
 0x491   :  { %s1069_s13 = sshll.u32 %s1598_s12, 4  ;;  %s1070_s13 = int_to_ptr.vmem [resolvable:$true] %s1069_s13 }
 0x492   :  { %s1566_s14 = scalar_lea.vmem %s1070_s13, 16  ;;  %s1570_s15 = scalar_lea.vmem %s1070_s13, 32 }
 0x493   :  { %p1567_p8 = scmp.ne.s32.totalorder %s1070_s13, %s1566_s14  ;;  %p1571_p9 = scmp.lt.s32.totalorder %s1070_s13, %s1070_s13 }
 0x494   :  { %p1572_p10 = scmp.lt.s32.totalorder %s1570_s15, %s1566_s14 }
 0x496   :  { %p1573_p11 = por %p1572_p10, %p1571_p9 }
 0x498   :  { %p1574_p12 = pnand %p1573_p11, %p1567_p8 }
 0x514   :  { %v1042_v13 = vpop.xlane.xlu1 %1041 }
 0x515   :  { %v1043_v34 = vsub.f32 0.0, %v1042_v13 }
 0x517   :  { %v1044_v2 = vrot.slane %v1043_v34, 4 }
 0x519   :  { %v1045_v3 = vadd.f32 %v1044_v2, %v1043_v34 }
 0x51b   :  { %v1046_v4 = vrot.slane %v1045_v3, 2 }
 0x51d   :  { %v1047_v5 = vadd.f32 %v1046_v4, %v1045_v3 }
 0x51f   :  { %v1048_v6 = vrot.slane %v1047_v5, 1 }
 0x521   :  { %v1049_v7 = vadd.f32 %v1048_v6, %v1047_v5 }
 0x523   :  { %v1050_v8 = vmul.f32 0.125, %v1049_v7 }
 0x525   :  { %1052 = vst.msk [vmem:[#allocation4] sm:$0x1] %vm1051_vm7, %v1050_v8 }
 0x526   :  { %1577 = shalt.err (!%p1574_p12)
}
 0x527   :  { %s1578_s17 = scalar_lea.hbm %s2109_s8, 16 }
 0x528   :  { %p1579_p13 = scmp.ne.s32.totalorder %s2109_s8, %s1578_s17  ;;  %p1582_p0 = scmp.lt.u32.totalorder %s1578_s17, %s2109_s8 }
 0x52a   :  { %p1584_p1 = pnand %p1582_p0, %p1579_p13 }
 0x52c   :  { %1587 = shalt.err (!%p1584_p1)
}
 0x52d   :  { %1072 = dma.vmem_to_hbm [thread:$0]  %s1070_s13, 16, %s2109_s8, [#allocation5]  }
 0x52e   :  { %1588 = dma.done.wait [#allocation3], 128  }
 0x52f   :  { %1589 = vsyncadd [#allocation3], 4294967168 }
 0x530   :  { %1590 = dma.done.wait [#allocation5], 16  }
 0x531   :  { %1591 = vsyncadd [#allocation5], 4294967280 }
 0x532   :  { %1079 = vsyncpa [#allocation3], 1 }
 0x533   :  { %1080 = vsyncpa [#allocation5], 1 }

</bundles_post_ra>
